<compile_context>
chip_gen: v5e
topology: v5e:2x2
jax: 0.10.0
libtpu: 0.0.40
codegen_flags: <defaults>
</compile_context>

<pallas_src>
import jax
import jax.numpy as jnp
from jax.experimental import pallas as pl
from jax.experimental.pallas import tpu as pltpu


def latent_reward_kernel(
    x_ref, w1_ref, b1_ref, w2_ref, b2_ref, w3_ref, b3_ref, w4_ref, b4_ref, o_ref
):
    """One batch tile: 3x (Linear+ReLU) on MXU, final H->1 on VPU/XLU, tanh on EUP."""
    mxu_dtype = w1_ref.dtype
    x = x_ref[...].astype(mxu_dtype)

    # Layer 1: Linear(D -> H) + ReLU   (f32 accumulation on the MXU)
    h = jnp.dot(x, w1_ref[...], preferred_element_type=jnp.float32) + b1_ref[...]
    h = jnp.maximum(h, 0.0)

    # Layer 2: Linear(H -> H) + ReLU
    h = jnp.dot(h.astype(mxu_dtype), w2_ref[...],
                preferred_element_type=jnp.float32) + b2_ref[...]
    h = jnp.maximum(h, 0.0)

    # Layer 3: Linear(H -> H) + ReLU
    h = jnp.dot(h.astype(mxu_dtype), w3_ref[...],
                preferred_element_type=jnp.float32) + b3_ref[...]
    h = jnp.maximum(h, 0.0)

    # Layer 4: Linear(H -> 1) as a VPU multiply + lane reduction.
    # w4_ref is [1, H] f32, h is [TB, H] f32 -> r is [1, TB] (lane-dense).
    r = jnp.sum(h * w4_ref[...], axis=-1).reshape(1, -1)
    o_ref[...] = jnp.tanh(r + b4_ref[...]).astype(o_ref.dtype)


def latent_reward_forward(x, params, *, block_rows=2048, use_bf16=False):
    """x: [B, D] float32. params: dict of (w1,b1,...,w4,b4). Returns [B, 1] f32."""
    B, D = x.shape
    H = params["w1"].shape[1]

    # --- batch tiling / padding ---------------------------------------------
    # block_rows must be a multiple of 128 so the lane-dense (1, TB) output
    # block satisfies the (8, 128) rule when there is more than one tile.
    block_rows = max(128, (block_rows // 128) * 128)
    if B <= block_rows:
        TB = max(8, ((B + 7) // 8) * 8)   # single tile == full (padded) batch
        PB = TB
    else:
        TB = block_rows
        PB = ((B + TB - 1) // TB) * TB
    if PB != B:
        x = jnp.pad(x, ((0, PB - B), (0, 0)))
    grid = (PB // TB,)

    # --- operand preparation -------------------------------------------------
    mxu_dtype = jnp.bfloat16 if use_bf16 else jnp.float32
    x_in = x.astype(mxu_dtype)
    w1 = params["w1"].astype(mxu_dtype)
    w2 = params["w2"].astype(mxu_dtype)
    w3 = params["w3"].astype(mxu_dtype)
    w4 = params["w4"].reshape(1, H).astype(jnp.float32)     # VPU path stays f32
    b1 = params["b1"].astype(jnp.float32)
    b2 = params["b2"].astype(jnp.float32)
    b3 = params["b3"].astype(jnp.float32)
    b4 = params["b4"].astype(jnp.float32)                   # [1, 1]

    def resident_spec(arr):
        # Constant index map -> fetched once, VMEM-resident across all tiles.
        return pl.BlockSpec(arr.shape, lambda i: (0,) * arr.ndim)

    weight_bytes = sum(
        int(a.size) * a.dtype.itemsize for a in (w1, b1, w2, b2, w3, b3, w4, b4)
    )
    cost = pl.CostEstimate(
        flops=2 * PB * (D * H + H * H + H * H + H),
        transcendentals=PB,
        bytes_accessed=int(x_in.size) * x_in.dtype.itemsize + weight_bytes + PB * 4,
    )

    out = pl.pallas_call(
        latent_reward_kernel,
        out_shape=jax.ShapeDtypeStruct((1, PB), jnp.float32),
        grid=grid,
        in_specs=[
            pl.BlockSpec((TB, D), lambda i: (i, 0)),
            resident_spec(w1), resident_spec(b1),
            resident_spec(w2), resident_spec(b2),
            resident_spec(w3), resident_spec(b3),
            resident_spec(w4), resident_spec(b4),
        ],
        out_specs=pl.BlockSpec((1, TB), lambda i: (0, i)),
        compiler_params=pltpu.CompilerParams(
            dimension_semantics=("parallel",),
        ),
        cost_estimate=cost,
    )(x_in, w1, b1, w2, b2, w3, b3, w4, b4)

    # Lane-dense (1, PB) -> [B, 1] (row-major order is preserved by reshape).
    return out.reshape(PB, 1)[:B]


def init_params(key, input_dim, hidden_dim=64):
    """Deterministic PyTorch-style uniform(-1/sqrt(fan_in), 1/sqrt(fan_in)) init."""
    sizes = [input_dim, hidden_dim, hidden_dim, hidden_dim, 1]
    params = {}
    keys = jax.random.split(key, 2 * (len(sizes) - 1))
    for j in range(len(sizes) - 1):
        fan_in, fan_out = sizes[j], sizes[j + 1]
        bound = 1.0 / jnp.sqrt(jnp.float32(fan_in))
        params[f"w{j+1}"] = jax.random.uniform(
            keys[2 * j], (fan_in, fan_out), jnp.float32, -bound, bound
        )
        params[f"b{j+1}"] = jax.random.uniform(
            keys[2 * j + 1], (1, fan_out), jnp.float32, -bound, bound
        )
    return params


def reference_forward(x, params):
    """Pure-JAX reference of the same math."""
    h = jnp.maximum(x @ params["w1"] + params["b1"], 0.0)
    h = jnp.maximum(h @ params["w2"] + params["b2"], 0.0)
    h = jnp.maximum(h @ params["w3"] + params["b3"], 0.0)
    return jnp.tanh(h @ params["w4"] + params["b4"])


if __name__ == "__main__":
    key = jax.random.PRNGKey(0)
    k_x, k_p = jax.random.split(key)

    B, D_IN, HIDDEN = 8, 32, 64
    x = jax.random.normal(k_x, (B, D_IN), dtype=jnp.float32)
    params = init_params(k_p, D_IN, HIDDEN)

    # 1) Small single-tile f32 path (exact check vs reference).
    out = jax.block_until_ready(latent_reward_forward(x, params))
    ref = reference_forward(x, params)
    assert out.shape == (B, 1)
    assert jnp.allclose(out, ref, atol=1e-5, rtol=1e-5), "f32 single-tile mismatch"

    # 2) Multi-tile path with a ragged batch (forces grid > 1 and zero padding).
    B2 = 300
    x2 = jax.random.normal(k_x, (B2, D_IN), dtype=jnp.float32)
    out2 = jax.block_until_ready(
        latent_reward_forward(x2, params, block_rows=128)
    )
    ref2 = reference_forward(x2, params)
    assert out2.shape == (B2, 1)
    assert jnp.allclose(out2, ref2, atol=1e-5, rtol=1e-5), "f32 multi-tile mismatch"

    # 3) bf16-MXU path (v6e/v7x optimization): looser tolerance for bf16 inputs.
    out3 = jax.block_until_ready(
        latent_reward_forward(x2, params, block_rows=128, use_bf16=True)
    )
    assert out3.shape == (B2, 1)
    assert jnp.allclose(out3, ref2, atol=5e-2, rtol=5e-2), "bf16 path mismatch"

    print("KERNEL_OK")
</pallas_src>

<mosaic_0001>
module attributes {stable_mosaic.version = 11 : i64} {
  func.func @latent_reward_kernel(%arg0: i32, %arg1: memref<8x32xf32, #tpu.memory_space<vmem>>, %arg2: memref<32x64xf32, #tpu.memory_space<vmem>>, %arg3: memref<1x64xf32, #tpu.memory_space<vmem>>, %arg4: memref<64x64xf32, #tpu.memory_space<vmem>>, %arg5: memref<1x64xf32, #tpu.memory_space<vmem>>, %arg6: memref<64x64xf32, #tpu.memory_space<vmem>>, %arg7: memref<1x64xf32, #tpu.memory_space<vmem>>, %arg8: memref<1x64xf32, #tpu.memory_space<vmem>>, %arg9: memref<1x1xf32, #tpu.memory_space<vmem>>, %arg10: memref<1x8xf32, #tpu.memory_space<vmem>>) attributes {dimension_semantics = [#tpu.dimension_semantics<parallel>], iteration_bounds = array<i64: 1>, scalar_prefetch = 0 : i64, scratch_operands = 0 : i64, tpu.core_type = #tpu.core_type<tc>, window_params = [{transform_indices = @transform_0, window_bounds = array<i64: 8, 32>}, {pipeline_mode = #tpu.pipeline_mode<synchronous>, transform_indices = @transform_1, window_bounds = array<i64: 32, 64>}, {pipeline_mode = #tpu.pipeline_mode<synchronous>, transform_indices = @transform_2, window_bounds = array<i64: 1, 64>}, {pipeline_mode = #tpu.pipeline_mode<synchronous>, transform_indices = @transform_3, window_bounds = array<i64: 64, 64>}, {pipeline_mode = #tpu.pipeline_mode<synchronous>, transform_indices = @transform_4, window_bounds = array<i64: 1, 64>}, {pipeline_mode = #tpu.pipeline_mode<synchronous>, transform_indices = @transform_5, window_bounds = array<i64: 64, 64>}, {pipeline_mode = #tpu.pipeline_mode<synchronous>, transform_indices = @transform_6, window_bounds = array<i64: 1, 64>}, {pipeline_mode = #tpu.pipeline_mode<synchronous>, transform_indices = @transform_7, window_bounds = array<i64: 1, 64>}, {pipeline_mode = #tpu.pipeline_mode<synchronous>, transform_indices = @transform_8, window_bounds = array<i64: 1, 1>}, {transform_indices = @transform_9, window_bounds = array<i64: 1, 8>}]} {
    %c0 = arith.constant 0 : index
    %c0_0 = arith.constant 0 : index
    %0 = vector.load %arg1[%c0, %c0_0] : memref<8x32xf32, #tpu.memory_space<vmem>>, vector<8x32xf32>
    %c0_1 = arith.constant 0 : index
    %c0_2 = arith.constant 0 : index
    %1 = vector.load %arg2[%c0_1, %c0_2] : memref<32x64xf32, #tpu.memory_space<vmem>>, vector<32x64xf32>
    %cst = arith.constant dense<0.000000e+00> : vector<8x64xf32>
    %2 = tpu.matmul %0, %1, %cst {dimension_numbers = #tpu.dot_dimension_numbers<[1], [0], [0], [1], [0, 0, 1, 1], [], []>} : vector<8x32xf32>, vector<32x64xf32>, vector<8x64xf32> -> vector<8x64xf32>
    %c0_3 = arith.constant 0 : index
    %c0_4 = arith.constant 0 : index
    %3 = vector.load %arg3[%c0_3, %c0_4] : memref<1x64xf32, #tpu.memory_space<vmem>>, vector<1x64xf32>
    %4 = vector.broadcast %3 : vector<1x64xf32> to vector<8x64xf32>
    %5 = arith.addf %2, %4 : vector<8x64xf32>
    %cst_5 = arith.constant 0.000000e+00 : f32
    %6 = vector.broadcast %cst_5 : f32 to vector<8x64xf32>
    %7 = arith.maximumf %5, %6 : vector<8x64xf32>
    %c0_6 = arith.constant 0 : index
    %c0_7 = arith.constant 0 : index
    %8 = vector.load %arg4[%c0_6, %c0_7] : memref<64x64xf32, #tpu.memory_space<vmem>>, vector<64x64xf32>
    %cst_8 = arith.constant dense<0.000000e+00> : vector<8x64xf32>
    %9 = tpu.matmul %7, %8, %cst_8 {dimension_numbers = #tpu.dot_dimension_numbers<[1], [0], [0], [1], [0, 0, 1, 1], [], []>} : vector<8x64xf32>, vector<64x64xf32>, vector<8x64xf32> -> vector<8x64xf32>
    %c0_9 = arith.constant 0 : index
    %c0_10 = arith.constant 0 : index
    %10 = vector.load %arg5[%c0_9, %c0_10] : memref<1x64xf32, #tpu.memory_space<vmem>>, vector<1x64xf32>
    %11 = vector.broadcast %10 : vector<1x64xf32> to vector<8x64xf32>
    %12 = arith.addf %9, %11 : vector<8x64xf32>
    %cst_11 = arith.constant 0.000000e+00 : f32
    %13 = vector.broadcast %cst_11 : f32 to vector<8x64xf32>
    %14 = arith.maximumf %12, %13 : vector<8x64xf32>
    %c0_12 = arith.constant 0 : index
    %c0_13 = arith.constant 0 : index
    %15 = vector.load %arg6[%c0_12, %c0_13] : memref<64x64xf32, #tpu.memory_space<vmem>>, vector<64x64xf32>
    %cst_14 = arith.constant dense<0.000000e+00> : vector<8x64xf32>
    %16 = tpu.matmul %14, %15, %cst_14 {dimension_numbers = #tpu.dot_dimension_numbers<[1], [0], [0], [1], [0, 0, 1, 1], [], []>} : vector<8x64xf32>, vector<64x64xf32>, vector<8x64xf32> -> vector<8x64xf32>
    %c0_15 = arith.constant 0 : index
    %c0_16 = arith.constant 0 : index
    %17 = vector.load %arg7[%c0_15, %c0_16] : memref<1x64xf32, #tpu.memory_space<vmem>>, vector<1x64xf32>
    %18 = vector.broadcast %17 : vector<1x64xf32> to vector<8x64xf32>
    %19 = arith.addf %16, %18 : vector<8x64xf32>
    %cst_17 = arith.constant 0.000000e+00 : f32
    %20 = vector.broadcast %cst_17 : f32 to vector<8x64xf32>
    %21 = arith.maximumf %19, %20 : vector<8x64xf32>
    %c0_18 = arith.constant 0 : index
    %c0_19 = arith.constant 0 : index
    %22 = vector.load %arg8[%c0_18, %c0_19] : memref<1x64xf32, #tpu.memory_space<vmem>>, vector<1x64xf32>
    %23 = vector.broadcast %22 : vector<1x64xf32> to vector<8x64xf32>
    %24 = arith.mulf %21, %23 : vector<8x64xf32>
    %cst_20 = arith.constant dense<0.000000e+00> : vector<8xf32>
    %25 = vector.multi_reduction <add>, %24, %cst_20 [1] : vector<8x64xf32> to vector<8xf32>
    %26 = vector.shape_cast %25 : vector<8xf32> to vector<1x8xf32>
    %c0_21 = arith.constant 0 : index
    %c0_22 = arith.constant 0 : index
    %27 = vector.load %arg9[%c0_21, %c0_22] : memref<1x1xf32, #tpu.memory_space<vmem>>, vector<1x1xf32>
    %28 = vector.broadcast %27 : vector<1x1xf32> to vector<1x8xf32>
    %29 = arith.addf %26, %28 : vector<1x8xf32>
    %30 = math.tanh %29 : vector<1x8xf32>
    %c0_23 = arith.constant 0 : index
    %c0_24 = arith.constant 0 : index
    %31 = vector.load %arg10[%c0_23, %c0_24] : memref<1x8xf32, #tpu.memory_space<vmem>>, vector<1x8xf32>
    tpu.vector_store %arg10[%c0_23, %c0_24], %30 {strides = array<i32>} : memref<1x8xf32, #tpu.memory_space<vmem>>, vector<1x8xf32>,
    return
  }
  func.func @transform_0(%arg0: i32) -> (i32, i32) {
    %c0_i32 = arith.constant 0 : i32
    %c0_i32_0 = arith.constant 0 : i32
    return %arg0, %c0_i32 : i32, i32
  }
  func.func @transform_1(%arg0: i32) -> (i32, i32) {
    %c0_i32 = arith.constant 0 : i32
    %c0_i32_0 = arith.constant 0 : i32
    %c0_i32_1 = arith.constant 0 : i32
    return %c0_i32, %c0_i32_0 : i32, i32
  }
  func.func @transform_2(%arg0: i32) -> (i32, i32) {
    %c0_i32 = arith.constant 0 : i32
    %c0_i32_0 = arith.constant 0 : i32
    %c0_i32_1 = arith.constant 0 : i32
    return %c0_i32, %c0_i32_0 : i32, i32
  }
  func.func @transform_3(%arg0: i32) -> (i32, i32) {
    %c0_i32 = arith.constant 0 : i32
    %c0_i32_0 = arith.constant 0 : i32
    %c0_i32_1 = arith.constant 0 : i32
    return %c0_i32, %c0_i32_0 : i32, i32
  }
  func.func @transform_4(%arg0: i32) -> (i32, i32) {
    %c0_i32 = arith.constant 0 : i32
    %c0_i32_0 = arith.constant 0 : i32
    %c0_i32_1 = arith.constant 0 : i32
    return %c0_i32, %c0_i32_0 : i32, i32
  }
  func.func @transform_5(%arg0: i32) -> (i32, i32) {
    %c0_i32 = arith.constant 0 : i32
    %c0_i32_0 = arith.constant 0 : i32
    %c0_i32_1 = arith.constant 0 : i32
    return %c0_i32, %c0_i32_0 : i32, i32
  }
  func.func @transform_6(%arg0: i32) -> (i32, i32) {
    %c0_i32 = arith.constant 0 : i32
    %c0_i32_0 = arith.constant 0 : i32
    %c0_i32_1 = arith.constant 0 : i32
    return %c0_i32, %c0_i32_0 : i32, i32
  }
  func.func @transform_7(%arg0: i32) -> (i32, i32) {
    %c0_i32 = arith.constant 0 : i32
    %c0_i32_0 = arith.constant 0 : i32
    %c0_i32_1 = arith.constant 0 : i32
    return %c0_i32, %c0_i32_0 : i32, i32
  }
  func.func @transform_8(%arg0: i32) -> (i32, i32) {
    %c0_i32 = arith.constant 0 : i32
    %c0_i32_0 = arith.constant 0 : i32
    %c0_i32_1 = arith.constant 0 : i32
    return %c0_i32, %c0_i32_0 : i32, i32
  }
  func.func @transform_9(%arg0: i32) -> (i32, i32) {
    %c0_i32 = arith.constant 0 : i32
    %c0_i32_0 = arith.constant 0 : i32
    return %c0_i32, %arg0 : i32, i32
  }
}

</mosaic_0001>

<bundles_post_ra>
// kernel: tpu_custom_call.1
= control target key start
LH: loop header
LB: loop body
LE: loop exit
PB: predicated region body
PF: predicated region fallthrough
CT: control target
= control target key end

     0   :  { %s483_s0 = inlined_call_operand.hbm [shape: f32[8,32], index: 0, kind: input, shape index: {}]   ;;  %s484_s1 = inlined_call_operand.hbm [shape: f32[32,64], index: 1, kind: input, shape index: {}]   ;;  %s485_s2 = inlined_call_operand.vmem [shape: f32[1,64], index: 2, kind: input, shape index: {}]   ;;  %s486_s3 = inlined_call_operand.hbm [shape: f32[64,64], index: 3, kind: input, shape index: {}]   ;;  %s487_s4 = inlined_call_operand.vmem [shape: f32[1,64], index: 4, kind: input, shape index: {}]   ;;  %s488_s5 = inlined_call_operand.hbm [shape: f32[64,64], index: 5, kind: input, shape index: {}]   ;;  %s489_s6 = inlined_call_operand.vmem [shape: f32[1,64], index: 6, kind: input, shape index: {}]   ;;  %s490_s7 = inlined_call_operand.vmem [shape: f32[1,64], index: 7, kind: input, shape index: {}]   ;;  %s491_s8 = inlined_call_operand.<no memory space> [shape: f32[1,1], index: 8, kind: input, shape index: {}]   ;;  %s492_s9 = inlined_call_operand.hbm [shape: f32[1,8], index: 9, kind: output, shape index: {}]  }
   0x1   :  { %v14_v0 = vstv %s491_s8 }
   0x2   :  { %15 = vst [vmem:[#allocation2] sm:$0x1] %v14_v0 }
   0x3   :  { %16 = vsyncpa [#allocation4], 0 }
   0x4   :  { %17 = vsyncpa [#allocation7], 0 }
   0x5   :  { %18 = vsyncpa [#allocation10], 0  ;;  %s35_s13 = sshll.u32 %s484_s1, 4  ;;  %s36_s13 = int_to_ptr.hbm [resolvable:$true] %s35_s13 }
   0x6   :  { %19 = vsyncpa [#allocation5], 0  ;;  %s392_s14 = smov [#allocation6]   ;;  %s25_s18 = sshll.u32 %s483_s0, 4  ;;  %s26_s18 = int_to_ptr.hbm [resolvable:$true] %s25_s18 }
   0x7   :  { %s37_s15 = sshll.u32 %s392_s14, 4  ;;  %s393_s19 = smov 128   ;;  %s38_s15 = int_to_ptr.vmem [resolvable:$true] %s37_s15 }
   0x8   :  { %s394_s20 = smov 8   ;;  %s395_s8 = smov [#allocation3]  }
   0x9   :  { %43 = dma.hbm_to_vmem [thread:$0]  %s36_s13, 512, %s38_s15, [#allocation7], %s393_s19, %s393_s19, %s394_s20  }
   0xa   :  { %s27_s21 = sshll.u32 %s395_s8, 4  ;;  %s50_s24 = sshll.u32 %s486_s3, 4  ;;  %s28_s21 = int_to_ptr.vmem [resolvable:$true] %s27_s21  ;;  %s51_s24 = int_to_ptr.hbm [resolvable:$true] %s50_s24 }
   0xb   :  { %30 = dma.hbm_to_vmem [thread:$0]  %s26_s18, 128, %s28_s21, [#allocation4]  }
   0xc   :  { %s65_s26 = sshll.u32 %s488_s5, 4  ;;  %s396_s27 = smov [#allocation8]   ;;  %s66_s26 = int_to_ptr.hbm [resolvable:$true] %s65_s26 }
   0xd   :  { %s52_s28 = sshll.u32 %s396_s27, 4  ;;  %s397_s0 = smov [#allocation9]   ;;  %s53_s28 = int_to_ptr.vmem [resolvable:$true] %s52_s28 }
   0xe   :  { %58 = dma.hbm_to_vmem [thread:$0]  %s51_s24, 1024, %s53_s28, [#allocation7], %s393_s19, %s393_s19, %s394_s20  }
   0xf   :  { %s67_s29 = sshll.u32 %s397_s0, 4  ;;  %s68_s29 = int_to_ptr.vmem [resolvable:$true] %s67_s29 }
  0x10   :  { %73 = dma.hbm_to_vmem [thread:$0]  %s66_s26, 1024, %s68_s29, [#allocation10], %s393_s19, %s393_s19, %s394_s20  }
  0x11   :  { %384 = dma.done.wait [#allocation4], 128  }
  0x12   :  { %385 = vsyncadd [#allocation4], 4294967168 }
  0x13   :  { %386 = dma.done.wait [#allocation7], 1536  }
  0x14   :  { %387 = vsyncadd [#allocation7], 4294965760 }
  0x15   :  { %388 = dma.done.wait [#allocation10], 1024  }
  0x16   :  { %389 = vsyncadd [#allocation10], 4294966272  ;;  %v100_v1 = vld [vmem:[#allocation6 + $0x18] sm:$0xff]  ;;  %v99_v2 = vld [vmem:[#allocation6 + $0x10] sm:$0xff]  ;;  %vm105_vm0 = vcmask 261120   ;;  %vm142_vm1 = vcmask 523264   ;;  %v221_v43 = vlaneseq }
  0x17   :  { %121 = vmatpush.msra.mxu0 %v100_v1  ;;  %v137_v3 = vld [vmem:[#allocation8 + $0x38] sm:$0xff]  ;;  %v98_v4 = vld [vmem:[#allocation6 + $0x8] sm:$0xff]  ;;  %v136_v5 = vld [vmem:[#allocation8 + $0x30] sm:$0xff]  ;;  %v398_v27 = vmov 0   ;;  %s234_s16 = sshll.u32 %s492_s9, 4  ;;  %vm225_vm2 = vcmask 57344   ;;  %s235_s16 = int_to_ptr.hbm [resolvable:$true] %s234_s16 }
  0x18   :  { %154 = vmatpush.msra.mxu1 %v137_v3  ;;  %v97_v6 = vld [vmem:[#allocation6] sm:$0xff]  ;;  %v135_v7 = vld [vmem:[#allocation8 + $0x28] sm:$0xff]  ;;  %v96_v8 = vld [vmem:[#allocation3] sm:$0xff]  ;;  %257 = vset.pattern.permute.xlu0 %v398_v27  ;;  %v222_v44 = vand.u32 127, %v221_v43 }
  0x19   :  { %122 = vmatpush.msra.mxu0 %v99_v2  ;;  %v134_v9 = vld [vmem:[#allocation8 + $0x20] sm:$0xff]  ;;  %v133_v10 = vld [vmem:[#allocation8 + $0x18] sm:$0xff]  ;;  %v132_v11 = vld [vmem:[#allocation8 + $0x10] sm:$0xff] }
  0x1a   :  { %155 = vmatpush.msra.mxu1 %v136_v5  ;;  %v131_v12 = vld [vmem:[#allocation8 + $0x8] sm:$0xff]  ;;  %v130_v13 = vld [vmem:[#allocation8] sm:$0xff]  ;;  %v174_v14 = vld [vmem:[#allocation9 + $0x38] sm:$0xff] }
  0x1b   :  { %123 = vmatpush.msra.mxu0 %v98_v4  ;;  %v173_v15 = vld [vmem:[#allocation9 + $0x30] sm:$0xff]  ;;  %190 = vmatpush.msra.mxu2 %v174_v14  ;;  %v172_v16 = vld [vmem:[#allocation9 + $0x28] sm:$0xff]  ;;  %v171_v17 = vld [vmem:[#allocation9 + $0x20] sm:$0xff] }
  0x1c   :  { %156 = vmatpush.msra.mxu1 %v135_v7  ;;  %v170_v18 = vld [vmem:[#allocation9 + $0x18] sm:$0xff]  ;;  %v258_v19 = vld [vmem:[%s485_s2] ss:$0 sm:$0xff]  ;;  %v168_v24 = vld [vmem:[#allocation9 + $0x8] sm:$0xff] }
  0x1d   :  { %124 = vmatpush.msra.mxu0 %v97_v6  ;;  %191 = vmatpush.msra.mxu2 %v173_v15  ;;  %v169_v23 = vld [vmem:[#allocation9 + $0x10] sm:$0xff]  ;;  %v167_v25 = vld [vmem:[#allocation9] sm:$0xff] }
  0x1e   :  { %246 = vmatmul.msk.f32.vlgmr.msra.gmra.mxu0 %vm105_vm0, %v96_v8  ;;  %157 = vmatpush.msra.mxu1 %v134_v9  ;;  %v211_v26 = vld [vmem:[#allocation2] sm:$0x1] }
  0x1f   :  { %192 = vmatpush.msra.mxu2 %v172_v16  ;;  %214 = vperm.xlu0 %257, %v211_v26   ;;  %v259_v28 = vld [vmem:[%s487_s4] ss:$0 sm:$0xff]  ;;  %s399_s4 = smov [#allocation11]  }
  0x20   :  { %158 = vmatpush.msra.mxu1 %v133_v10  ;;  %v260_v32 = vld [vmem:[%s489_s6] ss:$0 sm:$0xff]  ;;  %s232_s6 = sshll.u32 %s399_s4, 4  ;;  %s233_s6 = int_to_ptr.vmem [resolvable:$true] %s232_s6 }
  0x21   :  { %193 = vmatpush.msra.mxu2 %v171_v17  ;;  %v261_v35 = vld [vmem:[%s490_s7] ss:$0 sm:$0xff] }
  0x22   :  { %159 = vmatpush.msra.mxu1 %v132_v11 }
  0x23   :  { %194 = vmatpush.msra.mxu2 %v170_v18 }
  0x24   :  { %160 = vmatpush.msra.mxu1 %v131_v12 }
  0x25   :  { %195 = vmatpush.msra.mxu2 %v169_v23 }
  0x26   :  { %161 = vmatpush.msra.mxu1 %v130_v13 }
  0x27   :  { %196 = vmatpush.msra.mxu2 %v168_v24 }
  0x29   :  { %197 = vmatpush.msra.mxu2 %v167_v25 }
  0x91   :  { %v215_v39 = vpop.permute.xlu0 %214 }
  0x92   :  { %v217_v40 = vperm.slane %v215_v39, 0 }
  0x9b   :  { %v126_v20 = vpop.f32.mrf.mxu0 }
  0x9c   :  { %v127_v21 = vadd.f32 %v258_v19, %v126_v20 }
  0x9e   :  { %v129_v22 = vmax.f32 %v127_v21, 0.0 }
  0xa0   :  { %247 = vmatmul.msk.f32.vlgmr.msra.gmra.mxu1 %vm142_vm1, %v129_v22 }
 0x11d   :  { %v163_v29 = vpop.f32.mrf.mxu1 }
 0x11e   :  { %v164_v30 = vadd.f32 %v259_v28, %v163_v29 }
 0x120   :  { %v166_v31 = vmax.f32 %v164_v30, 0.0 }
 0x122   :  { %248 = vmatmul.msk.f32.vlgmr.msra.gmra.mxu2 %vm142_vm1, %v166_v31 }
 0x1a5   :  { %v199_v33 = vpop.f32.mrf.mxu2 }
 0x1a6   :  { %v200_v34 = vadd.f32 %v260_v32, %v199_v33 }
 0x1a8   :  { %v202_v36 = vmax.f32 %v200_v34, 0.0 }
 0x1aa   :  { %v207_v37 = vmul.f32 %v261_v35, %v202_v36 }
 0x1ac   :  { %v208_v38 = vsel %vm142_vm1, %v207_v37, 0.0 }
 0x1ad   :  { %209 = vadd.xlane.f32.xlu0 %v208_v38 }
 0x220   :  { %v210_v41 = vpop.xlane.xlu0 %209 }
 0x221   :  { %v218_v42 = vadd.f32 %v217_v40, %v210_v41 }
 0x223   :  { %262 = vtanh.f32 %v218_v42 }
 0x229   :  { %v263_v45 = vpop.eup %262 }
 0x22a   :  { %v223_v46 = vperm.slane %v263_v45, %v222_v44 }
 0x22c   :  { %226 = vst.msk [vmem:[#allocation11] sm:$0x1] %vm225_vm2, %v223_v46 }
 0x22d   :  { %237 = dma.vmem_to_hbm [thread:$0]  %s233_s6, 16, %s235_s16, [#allocation5]  }
 0x22e   :  { %390 = dma.done.wait [#allocation5], 16  }
 0x22f   :  { %391 = vsyncadd [#allocation5], 4294967280 }
 0x230   :  { %242 = vsyncpa [#allocation4], 1 }
 0x231   :  { %243 = vsyncpa [#allocation7], 1 }
 0x232   :  { %244 = vsyncpa [#allocation10], 1 }
 0x233   :  { %245 = vsyncpa [#allocation5], 1 }

</bundles_post_ra>
